<compile_context>
chip_gen: v6e
topology: v6e:2x2x1
jax: 0.10.0
libtpu: 0.0.40
codegen_flags: <defaults>
</compile_context>

<pallas_src>
import jax
import jax.numpy as jnp
from jax.experimental import pallas as pl
from jax.experimental.pallas import tpu as pltpu

ACT_BIT = 32
QMIN = float(-(2 ** (ACT_BIT - 1)) + 1)   # -2^31 + 1
QMAX = float(2 ** (ACT_BIT - 1) - 1)      #  2^31 - 1
ALPHA = 123.0                             # alpha_coeff of cs.ReLu


def _round_up(x, m):
    return (x + m - 1) // m * m


def _make_kernel(shifts, lout):
    """Kernel closure over the static flat-pixel tap offsets."""

    def kernel(img_ref, wconv_ref, bconv_ref, poolw_ref, wdense_ref,
               bdense_ref, out_ref):
        nb = img_ref.shape[1]                      # images in this grid step
        p = img_ref[0]                             # (nb, lp_pad) f32

        # im2col built in VMEM: 9 statically shifted views of the flat padded
        # pixel axis.  Shifted-in garbage only lands on columns that the
        # pooling weights mask to zero.
        taps = [p[:, s:s + lout] for s in shifts]  # 9 x (nb, lout)

        for b in range(nb):                        # static unroll, nb is small
            tap_b = jnp.concatenate([t[b:b + 1, :] for t in taps], axis=0)  # (9, lout)

            # 3x3 conv (Cin=1, Cout=32, stride 1, pad 1) as ONE MXU matmul.
            conv = jnp.dot(wconv_ref[...], tap_b,
                           preferred_element_type=jnp.float32)      # (32, lout)
            # clipped ReLU (cs.ReLu(alpha))
            act = jnp.clip(conv + bconv_ref[...], 0.0, ALPHA)

            # Masked global average pool as one MXU matvec: poolw carries the
            # flat-layout validity mask and the 1/(H*W) scale.
            pooled = jnp.dot(act, poolw_ref[...],
                             preferred_element_type=jnp.float32)    # (32, 1)

            # dense 32 -> 10
            logits = jnp.dot(wdense_ref[...], pooled,
                             preferred_element_type=jnp.float32)    # (10, 1)
            out_ref[0, :, b:b + 1] = logits + bdense_ref[...]

    return kernel


def exercise4_forward(x, conv_w, conv_b, dense_w, dense_b):
    """x: (N, 1, H, W) f32 NCHW.  Weights in PyTorch conventions:
       conv_w (32,1,3,3), conv_b (32,), dense_w (10,32), dense_b (10,)."""
    n, c, h, w = x.shape
    assert c == 1
    wp2 = w + 2                                    # padded row pitch
    lp = (h + 2) * wp2                             # flat padded length
    lout = _round_up(h * wp2, 128)                 # conv-output columns (>= all valid pixels)
    s_max = 2 * wp2 + 2                            # largest tap shift
    lp_pad = _round_up(max(lp, lout + s_max), 128)
    assert lout <= 65536                           # see TODO about pixel tiling

    # images per grid step (merge small images so a step isn't dominated by
    # the fixed per-step overhead); one image per step for large images.
    nb = int(max(1, min(n, 4096 // lp_pad)))
    n_pad = _round_up(n, nb)
    n_blk = n_pad // nb

    # tap k = (dh, dw) row-major  ->  flat offset dh*(W+2) + dw
    shifts = tuple(dh * wp2 + dw for dh in range(3) for dw in range(3))

    # ---- glue (plain JAX): quant clamp, pad, flatten, constant prep ----
    xq = jnp.clip(x[:, 0].astype(jnp.float32), QMIN, QMAX)   # identity at f32 scale
    xp = jnp.pad(xq, ((0, n_pad - n), (1, 1), (1, 1)))       # (n_pad, H+2, W+2)
    flat = xp.reshape(n_pad, lp)
    flat = jnp.pad(flat, ((0, 0), (0, lp_pad - lp)))
    img = flat.reshape(n_blk, nb, lp_pad)                    # (n_blk, nb, lp_pad) f32

    wconv = conv_w.reshape(32, 9).astype(jnp.float32)        # (32, 9)
    bconv = conv_b.reshape(32, 1).astype(jnp.float32)        # (32, 1)
    wdense = dense_w.astype(jnp.float32)                     # (10, 32)
    bdense = dense_b.reshape(10, 1).astype(jnp.float32)      # (10, 1)

    # pooling weights over the flat conv-output columns: validity mask of the
    # padded row-major layout * 1/(H*W).
    m = jnp.arange(lout)
    valid = ((m % wp2) < w) & ((m // wp2) < h)
    poolw = (valid.astype(jnp.float32) / float(h * w)).reshape(lout, 1)

    kernel = _make_kernel(shifts, lout)
    out = pl.pallas_call(
        kernel,
        out_shape=jax.ShapeDtypeStruct((n_blk, 10, nb), jnp.float32),
        grid=(n_blk,),
        in_specs=[
            pl.BlockSpec((1, nb, lp_pad), lambda i: (i, 0, 0)),   # image block
            pl.BlockSpec(wconv.shape, lambda i: (0, 0)),
            pl.BlockSpec(bconv.shape, lambda i: (0, 0)),
            pl.BlockSpec(poolw.shape, lambda i: (0, 0)),
            pl.BlockSpec(wdense.shape, lambda i: (0, 0)),
            pl.BlockSpec(bdense.shape, lambda i: (0, 0)),
        ],
        out_specs=pl.BlockSpec((1, 10, nb), lambda i: (i, 0, 0)),
        compiler_params=pltpu.CompilerParams(
            dimension_semantics=("parallel",)),
    )(img, wconv, bconv, poolw, wdense, bdense)

    # (n_blk, 10, nb) -> (N, 10); tiny transpose done by XLA in the wrapper.
    return jnp.transpose(out, (0, 2, 1)).reshape(n_pad, 10)[:n]


def _reference(x, conv_w, conv_b, dense_w, dense_b):
    xq = jnp.clip(x.astype(jnp.float32), QMIN, QMAX)
    out = jax.lax.conv_general_dilated(
        xq, conv_w.astype(jnp.float32), window_strides=(1, 1),
        padding=((1, 1), (1, 1)),
        dimension_numbers=("NCHW", "OIHW", "NCHW"))
    out = out + conv_b[None, :, None, None]
    out = jnp.clip(out, 0.0, ALPHA)
    pooled = jnp.mean(out, axis=(2, 3))               # (N, 32)
    return pooled @ dense_w.T + dense_b[None, :]      # (N, 10)


if __name__ == "__main__":
    key = jax.random.PRNGKey(0)
    kx, kw1, kb1, kw2, kb2 = jax.random.split(key, 5)

    N, H, W = 2, 16, 16
    x = jax.random.normal(kx, (N, 1, H, W), jnp.float32)

    # deterministic synthetic parameters (shapes from the module __init__)
    conv_w = jax.random.normal(kw1, (32, 1, 3, 3), jnp.float32) * 0.1
    conv_b = jax.random.normal(kb1, (32,), jnp.float32) * 0.1
    dense_w = jax.random.normal(kw2, (10, 32), jnp.float32) * 0.1
    dense_b = jax.random.normal(kb2, (10,), jnp.float32) * 0.1

    out = exercise4_forward(x, conv_w, conv_b, dense_w, dense_b)
    out = jax.block_until_ready(out)

    ref = _reference(x, conv_w, conv_b, dense_w, dense_b)
    assert out.shape == (N, 10), out.shape
    # f32 storage end-to-end; tolerance covers MXU default-precision rounding.
    assert jnp.allclose(out, ref, atol=2e-2, rtol=2e-2), (
        f"max abs err {jnp.max(jnp.abs(out - ref))}")

    print("KERNEL_OK")
</pallas_src>

<mosaic_0001>
module attributes {stable_mosaic.version = 11 : i64} {
  func.func @kernel(%arg0: i32, %arg1: memref<1x2x512xf32, #tpu.memory_space<vmem>>, %arg2: memref<32x9xf32, #tpu.memory_space<vmem>>, %arg3: memref<32x1xf32, #tpu.memory_space<vmem>>, %arg4: memref<384x1xf32, #tpu.memory_space<vmem>>, %arg5: memref<10x32xf32, #tpu.memory_space<vmem>>, %arg6: memref<10x1xf32, #tpu.memory_space<vmem>>, %arg7: memref<1x10x2xf32, #tpu.memory_space<vmem>>) attributes {dimension_semantics = [#tpu.dimension_semantics<parallel>], iteration_bounds = array<i64: 1>, scalar_prefetch = 0 : i64, scratch_operands = 0 : i64, tpu.core_type = #tpu.core_type<tc>, window_params = [{transform_indices = @transform_0, window_bounds = array<i64: 1, 2, 512>}, {pipeline_mode = #tpu.pipeline_mode<synchronous>, transform_indices = @transform_1, window_bounds = array<i64: 32, 9>}, {pipeline_mode = #tpu.pipeline_mode<synchronous>, transform_indices = @transform_2, window_bounds = array<i64: 32, 1>}, {pipeline_mode = #tpu.pipeline_mode<synchronous>, transform_indices = @transform_3, window_bounds = array<i64: 384, 1>}, {pipeline_mode = #tpu.pipeline_mode<synchronous>, transform_indices = @transform_4, window_bounds = array<i64: 10, 32>}, {pipeline_mode = #tpu.pipeline_mode<synchronous>, transform_indices = @transform_5, window_bounds = array<i64: 10, 1>}, {transform_indices = @transform_6, window_bounds = array<i64: 1, 10, 2>}]} {
    %c0 = arith.constant 0 : index
    %c0_0 = arith.constant 0 : index
    %c0_1 = arith.constant 0 : index
    %0 = vector.load %arg1[%c0, %c0_0, %c0_1] : memref<1x2x512xf32, #tpu.memory_space<vmem>>, vector<1x2x512xf32>
    %1 = vector.shape_cast %0 : vector<1x2x512xf32> to vector<2x512xf32>
    %2 = vector.extract_strided_slice %1 {offsets = [0, 0], sizes = [2, 384], strides = [1, 1]} : vector<2x512xf32> to vector<2x384xf32>
    %3 = vector.extract_strided_slice %1 {offsets = [0, 1], sizes = [2, 384], strides = [1, 1]} : vector<2x512xf32> to vector<2x384xf32>
    %4 = vector.extract_strided_slice %1 {offsets = [0, 2], sizes = [2, 384], strides = [1, 1]} : vector<2x512xf32> to vector<2x384xf32>
    %5 = vector.extract_strided_slice %1 {offsets = [0, 18], sizes = [2, 384], strides = [1, 1]} : vector<2x512xf32> to vector<2x384xf32>
    %6 = vector.extract_strided_slice %1 {offsets = [0, 19], sizes = [2, 384], strides = [1, 1]} : vector<2x512xf32> to vector<2x384xf32>
    %7 = vector.extract_strided_slice %1 {offsets = [0, 20], sizes = [2, 384], strides = [1, 1]} : vector<2x512xf32> to vector<2x384xf32>
    %8 = vector.extract_strided_slice %1 {offsets = [0, 36], sizes = [2, 384], strides = [1, 1]} : vector<2x512xf32> to vector<2x384xf32>
    %9 = vector.extract_strided_slice %1 {offsets = [0, 37], sizes = [2, 384], strides = [1, 1]} : vector<2x512xf32> to vector<2x384xf32>
    %10 = vector.extract_strided_slice %1 {offsets = [0, 38], sizes = [2, 384], strides = [1, 1]} : vector<2x512xf32> to vector<2x384xf32>
    %11 = vector.extract_strided_slice %2 {offsets = [0, 0], sizes = [1, 384], strides = [1, 1]} : vector<2x384xf32> to vector<1x384xf32>
    %12 = vector.extract_strided_slice %3 {offsets = [0, 0], sizes = [1, 384], strides = [1, 1]} : vector<2x384xf32> to vector<1x384xf32>
    %13 = vector.extract_strided_slice %4 {offsets = [0, 0], sizes = [1, 384], strides = [1, 1]} : vector<2x384xf32> to vector<1x384xf32>
    %14 = vector.extract_strided_slice %5 {offsets = [0, 0], sizes = [1, 384], strides = [1, 1]} : vector<2x384xf32> to vector<1x384xf32>
    %15 = vector.extract_strided_slice %6 {offsets = [0, 0], sizes = [1, 384], strides = [1, 1]} : vector<2x384xf32> to vector<1x384xf32>
    %16 = vector.extract_strided_slice %7 {offsets = [0, 0], sizes = [1, 384], strides = [1, 1]} : vector<2x384xf32> to vector<1x384xf32>
    %17 = vector.extract_strided_slice %8 {offsets = [0, 0], sizes = [1, 384], strides = [1, 1]} : vector<2x384xf32> to vector<1x384xf32>
    %18 = vector.extract_strided_slice %9 {offsets = [0, 0], sizes = [1, 384], strides = [1, 1]} : vector<2x384xf32> to vector<1x384xf32>
    %19 = vector.extract_strided_slice %10 {offsets = [0, 0], sizes = [1, 384], strides = [1, 1]} : vector<2x384xf32> to vector<1x384xf32>
    %20 = tpu.concatenate %11, %12, %13, %14, %15, %16, %17, %18, %19 in 0 : vector<1x384xf32>, vector<1x384xf32>, vector<1x384xf32>, vector<1x384xf32>, vector<1x384xf32>, vector<1x384xf32>, vector<1x384xf32>, vector<1x384xf32>, vector<1x384xf32> -> vector<9x384xf32>
    %c0_2 = arith.constant 0 : index
    %c0_3 = arith.constant 0 : index
    %21 = vector.load %arg2[%c0_2, %c0_3] : memref<32x9xf32, #tpu.memory_space<vmem>>, vector<32x9xf32>
    %cst = arith.constant dense<0.000000e+00> : vector<32x384xf32>
    %22 = tpu.matmul %21, %20, %cst {dimension_numbers = #tpu.dot_dimension_numbers<[1], [0], [0], [1], [0, 0, 1, 1], [], []>} : vector<32x9xf32>, vector<9x384xf32>, vector<32x384xf32> -> vector<32x384xf32>
    %c0_4 = arith.constant 0 : index
    %c0_5 = arith.constant 0 : index
    %23 = vector.load %arg3[%c0_4, %c0_5] : memref<32x1xf32, #tpu.memory_space<vmem>>, vector<32x1xf32>
    %24 = vector.broadcast %23 : vector<32x1xf32> to vector<32x384xf32>
    %25 = arith.addf %22, %24 : vector<32x384xf32>
    %cst_6 = arith.constant 0.000000e+00 : f32
    %cst_7 = arith.constant 1.230000e+02 : f32
    %26 = vector.broadcast %cst_6 : f32 to vector<32x384xf32>
    %27 = arith.maximumf %26, %25 : vector<32x384xf32>
    %28 = vector.broadcast %cst_7 : f32 to vector<32x384xf32>
    %29 = arith.minimumf %28, %27 : vector<32x384xf32>
    %c0_8 = arith.constant 0 : index
    %c0_9 = arith.constant 0 : index
    %30 = vector.load %arg4[%c0_8, %c0_9] : memref<384x1xf32, #tpu.memory_space<vmem>>, vector<384x1xf32>
    %cst_10 = arith.constant dense<0.000000e+00> : vector<32x1xf32>
    %31 = tpu.matmul %29, %30, %cst_10 {dimension_numbers = #tpu.dot_dimension_numbers<[1], [0], [0], [1], [0, 0, 1, 1], [], []>} : vector<32x384xf32>, vector<384x1xf32>, vector<32x1xf32> -> vector<32x1xf32>
    %c0_11 = arith.constant 0 : index
    %c0_12 = arith.constant 0 : index
    %32 = vector.load %arg5[%c0_11, %c0_12] : memref<10x32xf32, #tpu.memory_space<vmem>>, vector<10x32xf32>
    %cst_13 = arith.constant dense<0.000000e+00> : vector<10x1xf32>
    %33 = tpu.matmul %32, %31, %cst_13 {dimension_numbers = #tpu.dot_dimension_numbers<[1], [0], [0], [1], [0, 0, 1, 1], [], []>} : vector<10x32xf32>, vector<32x1xf32>, vector<10x1xf32> -> vector<10x1xf32>
    %c0_14 = arith.constant 0 : index
    %c0_15 = arith.constant 0 : index
    %34 = vector.load %arg6[%c0_14, %c0_15] : memref<10x1xf32, #tpu.memory_space<vmem>>, vector<10x1xf32>
    %35 = arith.addf %33, %34 : vector<10x1xf32>
    %c0_16 = arith.constant 0 : index
    %c0_17 = arith.constant 0 : index
    %c0_18 = arith.constant 0 : index
    %36 = vector.load %arg7[%c0_16, %c0_17, %c0_18] : memref<1x10x2xf32, #tpu.memory_space<vmem>>, vector<1x10x1xf32>
    %37 = vector.shape_cast %36 : vector<1x10x1xf32> to vector<10x1xf32>
    %38 = vector.shape_cast %35 : vector<10x1xf32> to vector<1x10x1xf32>
    tpu.vector_store %arg7[%c0_16, %c0_17, %c0_18], %38 {strides = array<i32>} : memref<1x10x2xf32, #tpu.memory_space<vmem>>, vector<1x10x1xf32>,
    %39 = vector.extract_strided_slice %2 {offsets = [1, 0], sizes = [1, 384], strides = [1, 1]} : vector<2x384xf32> to vector<1x384xf32>
    %40 = vector.extract_strided_slice %3 {offsets = [1, 0], sizes = [1, 384], strides = [1, 1]} : vector<2x384xf32> to vector<1x384xf32>
    %41 = vector.extract_strided_slice %4 {offsets = [1, 0], sizes = [1, 384], strides = [1, 1]} : vector<2x384xf32> to vector<1x384xf32>
    %42 = vector.extract_strided_slice %5 {offsets = [1, 0], sizes = [1, 384], strides = [1, 1]} : vector<2x384xf32> to vector<1x384xf32>
    %43 = vector.extract_strided_slice %6 {offsets = [1, 0], sizes = [1, 384], strides = [1, 1]} : vector<2x384xf32> to vector<1x384xf32>
    %44 = vector.extract_strided_slice %7 {offsets = [1, 0], sizes = [1, 384], strides = [1, 1]} : vector<2x384xf32> to vector<1x384xf32>
    %45 = vector.extract_strided_slice %8 {offsets = [1, 0], sizes = [1, 384], strides = [1, 1]} : vector<2x384xf32> to vector<1x384xf32>
    %46 = vector.extract_strided_slice %9 {offsets = [1, 0], sizes = [1, 384], strides = [1, 1]} : vector<2x384xf32> to vector<1x384xf32>
    %47 = vector.extract_strided_slice %10 {offsets = [1, 0], sizes = [1, 384], strides = [1, 1]} : vector<2x384xf32> to vector<1x384xf32>
    %48 = tpu.concatenate %39, %40, %41, %42, %43, %44, %45, %46, %47 in 0 : vector<1x384xf32>, vector<1x384xf32>, vector<1x384xf32>, vector<1x384xf32>, vector<1x384xf32>, vector<1x384xf32>, vector<1x384xf32>, vector<1x384xf32>, vector<1x384xf32> -> vector<9x384xf32>
    %c0_19 = arith.constant 0 : index
    %c0_20 = arith.constant 0 : index
    %49 = vector.load %arg2[%c0_19, %c0_20] : memref<32x9xf32, #tpu.memory_space<vmem>>, vector<32x9xf32>
    %cst_21 = arith.constant dense<0.000000e+00> : vector<32x384xf32>
    %50 = tpu.matmul %49, %48, %cst_21 {dimension_numbers = #tpu.dot_dimension_numbers<[1], [0], [0], [1], [0, 0, 1, 1], [], []>} : vector<32x9xf32>, vector<9x384xf32>, vector<32x384xf32> -> vector<32x384xf32>
    %c0_22 = arith.constant 0 : index
    %c0_23 = arith.constant 0 : index
    %51 = vector.load %arg3[%c0_22, %c0_23] : memref<32x1xf32, #tpu.memory_space<vmem>>, vector<32x1xf32>
    %52 = vector.broadcast %51 : vector<32x1xf32> to vector<32x384xf32>
    %53 = arith.addf %50, %52 : vector<32x384xf32>
    %cst_24 = arith.constant 0.000000e+00 : f32
    %cst_25 = arith.constant 1.230000e+02 : f32
    %54 = vector.broadcast %cst_24 : f32 to vector<32x384xf32>
    %55 = arith.maximumf %54, %53 : vector<32x384xf32>
    %56 = vector.broadcast %cst_25 : f32 to vector<32x384xf32>
    %57 = arith.minimumf %56, %55 : vector<32x384xf32>
    %c0_26 = arith.constant 0 : index
    %c0_27 = arith.constant 0 : index
    %58 = vector.load %arg4[%c0_26, %c0_27] : memref<384x1xf32, #tpu.memory_space<vmem>>, vector<384x1xf32>
    %cst_28 = arith.constant dense<0.000000e+00> : vector<32x1xf32>
    %59 = tpu.matmul %57, %58, %cst_28 {dimension_numbers = #tpu.dot_dimension_numbers<[1], [0], [0], [1], [0, 0, 1, 1], [], []>} : vector<32x384xf32>, vector<384x1xf32>, vector<32x1xf32> -> vector<32x1xf32>
    %c0_29 = arith.constant 0 : index
    %c0_30 = arith.constant 0 : index
    %60 = vector.load %arg5[%c0_29, %c0_30] : memref<10x32xf32, #tpu.memory_space<vmem>>, vector<10x32xf32>
    %cst_31 = arith.constant dense<0.000000e+00> : vector<10x1xf32>
    %61 = tpu.matmul %60, %59, %cst_31 {dimension_numbers = #tpu.dot_dimension_numbers<[1], [0], [0], [1], [0, 0, 1, 1], [], []>} : vector<10x32xf32>, vector<32x1xf32>, vector<10x1xf32> -> vector<10x1xf32>
    %c0_32 = arith.constant 0 : index
    %c0_33 = arith.constant 0 : index
    %62 = vector.load %arg6[%c0_32, %c0_33] : memref<10x1xf32, #tpu.memory_space<vmem>>, vector<10x1xf32>
    %63 = arith.addf %61, %62 : vector<10x1xf32>
    %c0_34 = arith.constant 0 : index
    %c0_35 = arith.constant 0 : index
    %c1 = arith.constant 1 : index
    %64 = vector.load %arg7[%c0_34, %c0_35, %c1] : memref<1x10x2xf32, #tpu.memory_space<vmem>>, vector<1x10x1xf32>
    %65 = vector.shape_cast %64 : vector<1x10x1xf32> to vector<10x1xf32>
    %66 = vector.shape_cast %63 : vector<10x1xf32> to vector<1x10x1xf32>
    tpu.vector_store %arg7[%c0_34, %c0_35, %c1], %66 {strides = array<i32>} : memref<1x10x2xf32, #tpu.memory_space<vmem>>, vector<1x10x1xf32>,
    return
  }
  func.func @transform_0(%arg0: i32) -> (i32, i32, i32) {
    %c0_i32 = arith.constant 0 : i32
    %c0_i32_0 = arith.constant 0 : i32
    %c0_i32_1 = arith.constant 0 : i32
    return %arg0, %c0_i32, %c0_i32_0 : i32, i32, i32
  }
  func.func @transform_1(%arg0: i32) -> (i32, i32) {
    %c0_i32 = arith.constant 0 : i32
    %c0_i32_0 = arith.constant 0 : i32
    %c0_i32_1 = arith.constant 0 : i32
    return %c0_i32, %c0_i32_0 : i32, i32
  }
  func.func @transform_2(%arg0: i32) -> (i32, i32) {
    %c0_i32 = arith.constant 0 : i32
    %c0_i32_0 = arith.constant 0 : i32
    %c0_i32_1 = arith.constant 0 : i32
    return %c0_i32, %c0_i32_0 : i32, i32
  }
  func.func @transform_3(%arg0: i32) -> (i32, i32) {
    %c0_i32 = arith.constant 0 : i32
    %c0_i32_0 = arith.constant 0 : i32
    %c0_i32_1 = arith.constant 0 : i32
    return %c0_i32, %c0_i32_0 : i32, i32
  }
  func.func @transform_4(%arg0: i32) -> (i32, i32) {
    %c0_i32 = arith.constant 0 : i32
    %c0_i32_0 = arith.constant 0 : i32
    %c0_i32_1 = arith.constant 0 : i32
    return %c0_i32, %c0_i32_0 : i32, i32
  }
  func.func @transform_5(%arg0: i32) -> (i32, i32) {
    %c0_i32 = arith.constant 0 : i32
    %c0_i32_0 = arith.constant 0 : i32
    %c0_i32_1 = arith.constant 0 : i32
    return %c0_i32, %c0_i32_0 : i32, i32
  }
  func.func @transform_6(%arg0: i32) -> (i32, i32, i32) {
    %c0_i32 = arith.constant 0 : i32
    %c0_i32_0 = arith.constant 0 : i32
    %c0_i32_1 = arith.constant 0 : i32
    return %arg0, %c0_i32, %c0_i32_0 : i32, i32, i32
  }
}

</mosaic_0001>

<bundles_post_ra>
// kernel: tpu_custom_call.1
= control target key start
LH: loop header
LB: loop body
LE: loop exit
PB: predicated region body
PF: predicated region fallthrough
CT: control target
= control target key end

     0   :  { %v25_v0 = vlaneseq  ;;  %s1764_s23 = smov 127   ;;  %s1766_s24 = smov 110   ;;  %v2679_v9 = vmov 0.0   ;;  %v1772_v10 = vmov 0   ;;  %vm217_vm0 = vcmask 72704   ;;  %s2672_s0 = inlined_call_operand.vmem [shape: f32[1,2,512], index: 0, kind: input, shape index: {}]   ;;  %s2673_s1 = inlined_call_operand.vmem [shape: f32[32,9], index: 1, kind: input, shape index: {}]   ;;  %s2674_s2 = inlined_call_operand.vmem [shape: f32[32,1], index: 2, kind: input, shape index: {}]   ;;  %s2675_s3 = inlined_call_operand.vmem [shape: f32[384,1], index: 3, kind: input, shape index: {}]   ;;  %s2676_s4 = inlined_call_operand.vmem [shape: f32[10,32], index: 4, kind: input, shape index: {}]   ;;  %s2677_s5 = inlined_call_operand.vmem [shape: f32[10,1], index: 5, kind: input, shape index: {}]   ;;  %s2678_s6 = inlined_call_operand.vmem [shape: f32[1,10,2], index: 6, kind: output, shape index: {}]  }
   0x1   :  { %v1815_v2 = vld [vmem:[%s2672_s0] sm:$0xff]  ;;  %s1765_s0 = smov 126   ;;  %s1767_s25 = smov 109   ;;  %300 = vmatprep.mubr.f32.mxu0 %v2679_v9  ;;  %1761 = vset.pattern.permute.xlu0 %v1772_v10  ;;  %v194_v23 = vld [vmem:[%s2674_s2 + $0x8] sm:$0xff]  ;;  %v196_v24 = vld [vmem:[%s2674_s2 + $0x18] sm:$0xff]  ;;  %vm52_vm1 = vcmask 1039360  }
   0x2   :  { %v1810_v1 = vshrl.u32 %v25_v0, 7  ;;  %s1768_s26 = smov 108   ;;  %s1769_s27 = smov 92   ;;  %v1869_v11 = vld [vmem:[%s2673_s1] sm:$0xff]  ;;  %1762 = vset.pattern.permute.xlu1 %v1772_v10  ;;  %v195_v25 = vld [vmem:[%s2674_s2 + $0x10] sm:$0xff]  ;;  %vm157_vm2 = vcmask 736256  }
   0x3   :  { %s1770_s28 = smov 90   ;;  %1636 = vmatprep.mubr.msk.f32.mxu1 %vm217_vm0, %v1869_v11  ;;  %s1773_s7 = smov 91   ;;  %v193_v22 = vld [vmem:[%s2674_s2] sm:$0xff]  ;;  %vm161_vm3 = vcmask 1040384   ;;  %vm67_vm4 = vcmask 1031168   ;;  %vm165_vm5 = vcmask 1041408  }
   0x4   :  { %v31_v3 = vsub.s32 2, %v1810_v1  ;;  %v27_v4 = vsub.s32 0, %v1810_v1  ;;  %v35_v5 = vsub.s32 4, %v1810_v1  ;;  %v752_v12 = vsub.s32 5, %v1810_v1 }
   0x5   :  { %v42_v13 = vsub.s32 6, %v1810_v1  ;;  %v748_v15 = vsub.s32 3, %v1810_v1  ;;  %v744_v18 = vsub.s32 1, %v1810_v1  ;;  %v759_v20 = vsub.s32 7, %v1810_v1 }
   0x6   :  { %v1821_v6 = vrot.slane %v1815_v2, %v31_v3  ;;  %v1824_v7 = vrot.slane %v1815_v2, %v27_v4  ;;  %v1831_v8 = vrot.slane %v1815_v2, %v35_v5  ;;  %v1884_v14 = vrot.slane %v1815_v2, %v752_v12 }
   0x7   :  { %v43_v16 = vrot.slane %v1815_v2, %v42_v13  ;;  %v1893_v17 = vrot.slane %v1815_v2, %v748_v15  ;;  %v1899_v19 = vrot.slane %v1815_v2, %v744_v18  ;;  %v760_v21 = vrot.slane %v1815_v2, %v759_v20 }
   0x8   :  { %46 = vrot.lane.b32.xlu0 %v1821_v6, %s1764_s23  ;;  %44 = vrot.lane.b32.xlu1 %v1824_v7, %s1764_s23  ;;  %vm82_vm6 = vcmask 900096   ;;  %vm169_vm7 = vcmask 1042432   ;;  %vm97_vm8 = vcmask 891904   ;;  %vm173_vm9 = vcmask 1043456  }
   0x9   :  { %vm112_vm10 = vcmask 883712   ;;  %vm177_vm11 = vcmask 1044480   ;;  %vm127_vm12 = vcmask 752640   ;;  %vm142_vm13 = vcmask 744448  }
   0xa   :  { %vm181_vm14 = vcmask 1045504   ;;  %vm185_vm15 = vcmask 1046528  }
   0xc   :  { %48 = vrot.lane.b32.xlu0 %v1831_v8, %s1764_s23  ;;  %61 = vrot.lane.b32.xlu1 %v1821_v6, %s1765_s0 }
  0x10   :  { %63 = vrot.lane.b32.xlu0 %v1831_v8, %s1765_s0  ;;  %59 = vrot.lane.b32.xlu1 %v1824_v7, %s1765_s0 }
  0x14   :  { %76 = vrot.lane.b32.xlu0 %v1821_v6, %s1766_s24  ;;  %78 = vrot.lane.b32.xlu1 %v1831_v8, %s1766_s24 }
  0x18   :  { %74 = vrot.lane.b32.xlu0 %v1824_v7, %s1766_s24  ;;  %91 = vrot.lane.b32.xlu1 %v1821_v6, %s1767_s25 }
  0x1c   :  { %93 = vrot.lane.b32.xlu0 %v1831_v8, %s1767_s25  ;;  %89 = vrot.lane.b32.xlu1 %v1824_v7, %s1767_s25 }
  0x20   :  { %106 = vrot.lane.b32.xlu0 %v1821_v6, %s1768_s26  ;;  %108 = vrot.lane.b32.xlu1 %v1831_v8, %s1768_s26 }
  0x24   :  { %104 = vrot.lane.b32.xlu0 %v1824_v7, %s1768_s26  ;;  %121 = vrot.lane.b32.xlu1 %v1821_v6, %s1769_s27 }
  0x28   :  { %123 = vrot.lane.b32.xlu0 %v1831_v8, %s1769_s27  ;;  %151 = vrot.lane.b32.xlu1 %v1821_v6, %s1770_s28 }
  0x2c   :  { %153 = vrot.lane.b32.xlu0 %v1831_v8, %s1770_s28  ;;  %119 = vrot.lane.b32.xlu1 %v1824_v7, %s1769_s27 }
  0x30   :  { %136 = vrot.lane.b32.xlu0 %v1821_v6, %s1773_s7  ;;  %138 = vrot.lane.b32.xlu1 %v1831_v8, %s1773_s7 }
  0x34   :  { %149 = vrot.lane.b32.xlu0 %v1824_v7, %s1770_s28  ;;  %134 = vrot.lane.b32.xlu1 %v1824_v7, %s1773_s7 }
  0x38   :  { %50 = vrot.lane.b32.xlu0 %v43_v16, %s1764_s23  ;;  %65 = vrot.lane.b32.xlu1 %v43_v16, %s1765_s0 }
  0x3c   :  { %80 = vrot.lane.b32.xlu0 %v43_v16, %s1766_s24  ;;  %95 = vrot.lane.b32.xlu1 %v43_v16, %s1767_s25 }
  0x40   :  { %110 = vrot.lane.b32.xlu0 %v43_v16, %s1768_s26  ;;  %125 = vrot.lane.b32.xlu1 %v43_v16, %s1769_s27 }
  0x44   :  { %155 = vrot.lane.b32.xlu0 %v43_v16, %s1770_s28  ;;  %140 = vrot.lane.b32.xlu1 %v43_v16, %s1773_s7 }
  0x48   :  { %199 = vperm.xlu0 %1761, %v193_v22   ;;  %204 = vperm.xlu1 %1762, %v194_v23  }
  0x4c   :  { %214 = vperm.xlu0 %1761, %v196_v24   ;;  %209 = vperm.xlu1 %1762, %v195_v25  }
  0x50   :  { %765 = vrot.lane.b32.xlu0 %v1884_v14, %s1764_s23  ;;  %763 = vrot.lane.b32.xlu1 %v1893_v17, %s1764_s23 }
  0x54   :  { %777 = vrot.lane.b32.xlu0 %v1893_v17, %s1765_s0  ;;  %761 = vrot.lane.b32.xlu1 %v1899_v19, %s1764_s23 }
  0x58   :  { %775 = vrot.lane.b32.xlu0 %v1899_v19, %s1765_s0  ;;  %779 = vrot.lane.b32.xlu1 %v1884_v14, %s1765_s0 }
  0x5c   :  { %793 = vrot.lane.b32.xlu0 %v1884_v14, %s1766_s24  ;;  %791 = vrot.lane.b32.xlu1 %v1893_v17, %s1766_s24 }
  0x60   :  { %805 = vrot.lane.b32.xlu0 %v1893_v17, %s1767_s25  ;;  %789 = vrot.lane.b32.xlu1 %v1899_v19, %s1766_s24 }
  0x64   :  { %803 = vrot.lane.b32.xlu0 %v1899_v19, %s1767_s25  ;;  %807 = vrot.lane.b32.xlu1 %v1884_v14, %s1767_s25 }
  0x68   :  { %821 = vrot.lane.b32.xlu0 %v1884_v14, %s1768_s26  ;;  %819 = vrot.lane.b32.xlu1 %v1893_v17, %s1768_s26 }
  0x6c   :  { %833 = vrot.lane.b32.xlu0 %v1893_v17, %s1769_s27  ;;  %817 = vrot.lane.b32.xlu1 %v1899_v19, %s1768_s26 }
  0x70   :  { %861 = vrot.lane.b32.xlu0 %v1893_v17, %s1770_s28  ;;  %835 = vrot.lane.b32.xlu1 %v1884_v14, %s1769_s27 }
  0x74   :  { %831 = vrot.lane.b32.xlu0 %v1899_v19, %s1769_s27  ;;  %863 = vrot.lane.b32.xlu1 %v1884_v14, %s1770_s28 }
  0x78   :  { %849 = vrot.lane.b32.xlu0 %v1884_v14, %s1773_s7  ;;  %847 = vrot.lane.b32.xlu1 %v1893_v17, %s1773_s7 }
  0x7a   :  { %v47_v26 = vpop.permute.xlu0 %46  ;;  %v45_v27 = vpop.permute.xlu1 %44 }
  0x7b   :  { %v53_v46 = vsel %vm52_vm1, %v45_v27, %v47_v26 }
  0x7c   :  { %845 = vrot.lane.b32.xlu0 %v1899_v19, %s1773_s7  ;;  %859 = vrot.lane.b32.xlu1 %v1899_v19, %s1770_s28  ;;  %v162_v53 = vsel %vm161_vm3, %v1824_v7, %v53_v46  ;;  %v2112_v46 = vld [vmem:[%s2675_s3 + $0xd8] sm:$0xff] }
  0x7e   :  { %v1969_v28 = vpop.permute.xlu0 %48  ;;  %v62_v29 = vpop.permute.xlu1 %61 }
  0x7f   :  { %v54_v47 = vsel %vm52_vm1, %v47_v26, %v1969_v28  ;;  %v2048_v26 = vld [vmem:[%s2675_s3 + $0xf0] sm:$0xff] }
  0x80   :  { %781 = vrot.lane.b32.xlu0 %v760_v21, %s1765_s0  ;;  %767 = vrot.lane.b32.xlu1 %v760_v21, %s1764_s23  ;;  %v163_v54 = vsel %vm161_vm3, %v1821_v6, %v54_v47 }
  0x82   :  { %v1973_v30 = vpop.permute.xlu0 %63  ;;  %v60_v31 = vpop.permute.xlu1 %59 }
  0x83   :  { %v69_v49 = vsel %vm67_vm4, %v62_v29, %v1973_v30  ;;  %v68_v50 = vsel %vm67_vm4, %v60_v31, %v62_v29  ;;  %v2058_v29 = vld [vmem:[%s2675_s3 + $0x70] sm:$0xff] }
  0x84   :  { %809 = vrot.lane.b32.xlu0 %v760_v21, %s1767_s25  ;;  %795 = vrot.lane.b32.xlu1 %v760_v21, %s1766_s24  ;;  %v167_v59 = vsel %vm165_vm5, %v163_v54, %v69_v49  ;;  %v166_v60 = vsel %vm165_vm5, %v162_v53, %v68_v50  ;;  %v2124_v49 = vld [vmem:[%s2675_s3 + $0xd0] sm:$0xff] }
  0x86   :  { %v77_v32 = vpop.permute.xlu0 %76  ;;  %v1977_v33 = vpop.permute.xlu1 %78 }
  0x87   :  { %v84_v51 = vsel %vm82_vm6, %v77_v32, %v1977_v33 }
  0x88   :  { %837 = vrot.lane.b32.xlu0 %v760_v21, %s1769_s27  ;;  %823 = vrot.lane.b32.xlu1 %v760_v21, %s1768_s26  ;;  %v171_v63 = vsel %vm169_vm7, %v167_v59, %v84_v51  ;;  %v2162_v59 = vld [vmem:[%s2675_s3 + $0xc0] sm:$0xff] }
  0x89   :  { %2703 = vst [vmem:[#allocation4_spill] sm:$0xff] %v2162_v59 }
  0x8a   :  { %v75_v34 = vpop.permute.xlu0 %74  ;;  %v92_v35 = vpop.permute.xlu1 %91 }
  0x8b   :  { %v83_v52 = vsel %vm82_vm6, %v75_v34, %v77_v32  ;;  %v2074_v34 = vld [vmem:[%s2675_s3 + $0xe8] sm:$0xff] }
  0x8c   :  { %851 = vrot.lane.b32.xlu0 %v760_v21, %s1773_s7  ;;  %865 = vrot.lane.b32.xlu1 %v760_v21, %s1770_s28  ;;  %v170_v0 = vsel %vm169_vm7, %v166_v60, %v83_v52  ;;  %v2135_v52 = vld [vmem:[%s2675_s3 + $0x50] sm:$0xff]  ;;  %s1774_s28 = smov 1  }
  0x8e   :  { %v1983_v36 = vpop.permute.xlu0 %93  ;;  %v90_v37 = vpop.permute.xlu1 %89 }
  0x8f   :  { %v99_v55 = vsel %vm97_vm8, %v92_v35, %v1983_v36  ;;  %v98_v56 = vsel %vm97_vm8, %v90_v37, %v92_v35  ;;  %v2086_v37 = vld [vmem:[%s2675_s3 + $0xe0] sm:$0xff] }
  0x90   :  { %906 = vperm.xlu0 %1761, %v194_v23   ;;  %901 = vperm.xlu1 %1762, %v193_v22   ;;  %v175_v3 = vsel %vm173_vm9, %v171_v63, %v99_v55  ;;  %v174_v4 = vsel %vm173_vm9, %v170_v0, %v98_v56  ;;  %v2038_v22 = vld [vmem:[%s2675_s3 + $0xf8] sm:$0xff]  ;;  %v2150_v55 = vld [vmem:[%s2675_s3 + $0xc8] sm:$0xff]  ;;  %v2175_v63 = vld [vmem:[%s2675_s3 + $0x40] sm:$0xff] }
  0x91   :  { %v2043_v23 = vld [vmem:[%s2675_s3 + $0x78] sm:$0xff]  ;;  %2701 = vst [vmem:[#allocation2_spill] sm:$0xff] %v2150_v55  ;;  %2704 = vst [vmem:[#allocation5_spill] sm:$0xff] %v2175_v63 }
  0x92   :  { %v107_v38 = vpop.permute.xlu0 %106  ;;  %v1985_v39 = vpop.permute.xlu1 %108 }
  0x93   :  { %v114_v61 = vsel %vm112_vm10, %v107_v38, %v1985_v39 }
  0x94   :  { %916 = vperm.xlu0 %1761, %v196_v24   ;;  %911 = vperm.xlu1 %1762, %v195_v25   ;;  %v179_v6 = vsel %vm177_vm11, %v175_v3, %v114_v61  ;;  %v2210_v3 = vld [vmem:[%s2675_s3 + $0x30] sm:$0xff] }
  0x95   :  { %2708 = vst [vmem:[#allocation9_spill] sm:$0xff] %v2210_v3 }
  0x96   :  { %v105_v40 = vpop.permute.xlu0 %104  ;;  %v122_v41 = vpop.permute.xlu1 %121 }
  0x97   :  { %v113_v62 = vsel %vm112_vm10, %v105_v40, %v107_v38 }
  0x98   :  { %v178_v7 = vsel %vm177_vm11, %v174_v4, %v113_v62  ;;  %v2215_v4 = vld [vmem:[%s2675_s3 + $0x170] sm:$0xff] }
  0x9a   :  { %v1987_v42 = vpop.permute.xlu0 %123  ;;  %v152_v43 = vpop.permute.xlu1 %151 }
  0x9b   :  { %v129_v1 = vsel %vm127_vm12, %v122_v41, %v1987_v42 }
  0x9c   :  { %v183_v16 = vsel %vm181_vm14, %v179_v6, %v129_v1  ;;  %v2196_v1 = vld [vmem:[%s2675_s3 + $0x178] sm:$0xff]  ;;  %v2230_v6 = vld [vmem:[%s2675_s3 + $0x28] sm:$0xff] }
  0x9d   :  { %2710 = vst [vmem:[#allocation11_spill] sm:$0xff] %v2230_v6 }
  0x9e   :  { %v1989_v44 = vpop.permute.xlu0 %153  ;;  %v120_v45 = vpop.permute.xlu1 %119 }
  0x9f   :  { %v159_v48 = vsel %vm157_vm2, %v152_v43, %v1989_v44  ;;  %v128_v2 = vsel %vm127_vm12, %v120_v45, %v122_v41  ;;  %v2097_v41 = vld [vmem:[%s2675_s3 + $0x60] sm:$0xff] }
  0xa0   :  { %1454 = vmatprep.subr.msk.mxu0 %vm161_vm3, %v159_v48  ;;  %v182_v18 = vsel %vm181_vm14, %v178_v7, %v128_v2  ;;  %v2202_v2 = vld [vmem:[%s2675_s3 + $0xb0] sm:$0xff]  ;;  %v2237_v7 = vld [vmem:[%s2675_s3 + $0x168] sm:$0xff] }
  0xa1   :  { %2707 = vst [vmem:[#allocation8_spill] sm:$0xff] %v2202_v2 }
  0xa2   :  { %v137_v57 = vpop.permute.xlu0 %136  ;;  %v2010_v58 = vpop.permute.xlu1 %138 }
  0xa3   :  { %v144_v5 = vsel %vm142_vm13, %v137_v57, %v2010_v58 }
  0xa4   :  { %v187_v20 = vsel %vm185_vm15, %v183_v16, %v144_v5  ;;  %v2223_v5 = vld [vmem:[%s2675_s3 + $0xa8] sm:$0xff] }
  0xa5   :  { %2709 = vst [vmem:[#allocation10_spill] sm:$0xff] %v2223_v5 }
  0xa6   :  { %v150_v10 = vpop.permute.xlu0 %149  ;;  %v135_v12 = vpop.permute.xlu1 %134 }
  0xa7   :  { %v143_v13 = vsel %vm142_vm13, %v135_v12, %v137_v57  ;;  %v158_v15 = vsel %vm157_vm2, %v150_v10, %v152_v43 }
  0xa8   :  { %1455 = vmatpush1.msk.msra.mxu0 %vm161_vm3, %v158_v15  ;;  %v186_v21 = vsel %vm185_vm15, %v182_v18, %v143_v13 }
  0xa9   :  { %266 = vmatprep.subr.mxu0 %v187_v20 }
  0xaa   :  { %v51_v24 = vpop.permute.xlu0 %50  ;;  %267 = vmatpush1.msra.mxu0 %v186_v21  ;;  %v66_v25 = vpop.permute.xlu1 %65 }
  0xab   :  { %v55_v27 = vsel %vm52_vm1, %v1969_v28, %v51_v24  ;;  %1456 = vmatmul.mubr.msk.f32.vlgmr.msra.gmra.mxu0 %vm217_vm0, %v1869_v11  ;;  %1486 = vmatprep.subr.mxu0 %v2038_v22  ;;  %v70_v32 = vsel %vm67_vm4, %v1973_v30, %v66_v25  ;;  %v2068_v28 = vld [vmem:[%s2673_s1 + $0x8] sm:$0xff] }
  0xac   :  { %v164_v31 = vsel %vm161_vm3, %v1831_v8, %v55_v27  ;;  %306 = vmatprep.mubr.f32.mxu0 %v2679_v9  ;;  %1487 = vmatpush3.msra.mxu0 %v2043_v23  ;;  %v2080_v8 = vld [vmem:[%s2675_s3 + $0x68] sm:$0xff] }
  0xad   :  { %1488 = vmatprep.subr.mxu0 %v2048_v26  ;;  %v168_v38 = vsel %vm165_vm5, %v164_v31, %v70_v32 }
  0xae   :  { %v81_v30 = vpop.permute.xlu0 %80  ;;  %v96_v35 = vpop.permute.xlu1 %95  ;;  %1489 = vmatpush3.msra.mxu0 %v2058_v29 }
  0xaf   :  { %v85_v40 = vsel %vm82_vm6, %v1977_v33, %v81_v30  ;;  %1457 = vmatmul.mubr.msk.f32.gmra.mxu0 %vm217_vm0, %v2068_v28  ;;  %1490 = vmatprep.subr.mxu0 %v2074_v34  ;;  %v100_v45 = vsel %vm97_vm8, %v1983_v36, %v96_v35  ;;  %v2106_v33 = vld [vmem:[%s2673_s1 + $0x10] sm:$0xff]  ;;  %v2118_v36 = vld [vmem:[%s2675_s3 + $0x58] sm:$0xff] }
  0xb0   :  { %v172_v43 = vsel %vm169_vm7, %v168_v38, %v85_v40  ;;  %312 = vmatprep.mubr.f32.mxu0 %v2679_v9  ;;  %1491 = vmatpush3.msra.mxu0 %v2080_v8 }
  0xb1   :  { %1492 = vmatprep.subr.mxu0 %v2086_v37  ;;  %v176_v50 = vsel %vm173_vm9, %v172_v43, %v100_v45 }
  0xb2   :  { %v111_v47 = vpop.permute.xlu0 %110  ;;  %v126_v48 = vpop.permute.xlu1 %125  ;;  %1493 = vmatpush3.msra.mxu0 %v2097_v41 }
  0xb3   :  { %v115_v51 = vsel %vm112_vm10, %v1985_v39, %v111_v47  ;;  %1458 = vmatmul.mubr.msk.f32.gmra.mxu0 %vm217_vm0, %v2106_v33  ;;  %1494 = vmatprep.subr.mxu0 %v2112_v46  ;;  %v130_v54 = vsel %vm127_vm12, %v1987_v42, %v126_v48  ;;  %v2144_v39 = vld [vmem:[%s2673_s1 + $0x18] sm:$0xff]  ;;  %v2156_v42 = vld [vmem:[%s2675_s3 + $0x48] sm:$0xff] }
  0xb4   :  { %v180_v53 = vsel %vm177_vm11, %v176_v50, %v115_v51  ;;  %318 = vmatprep.mubr.f32.mxu0 %v2679_v9  ;;  %1495 = vmatpush3.msra.mxu0 %v2118_v36  ;;  %2702 = vst [vmem:[#allocation3_spill] sm:$0xff] %v2156_v42 }
  0xb5   :  { %1496 = vmatprep.subr.mxu0 %v2124_v49  ;;  %v184_v62 = vsel %vm181_vm14, %v180_v53, %v130_v54 }
  0xb6   :  { %v156_v56 = vpop.permute.xlu0 %155  ;;  %v141_v57 = vpop.permute.xlu1 %140  ;;  %1497 = vmatpush3.msra.mxu0 %v2135_v52 }
  0xb7   :  { %v145_v60 = vsel %vm142_vm13, %v2010_v58, %v141_v57  ;;  %1459 = vmatmul.mubr.msk.f32.gmra.mxu0 %vm217_vm0, %v2144_v39  ;;  %v160_v61 = vsel %vm157_vm2, %v1989_v44, %v156_v56  ;;  %1498 = vmatprep.subr.mxu0 %v2150_v55  ;;  %v2183_v58 = vld [vmem:[%s2675_s3 + $0xb8] sm:$0xff] }
  0xb8   :  { %1632 = vmatprep.subr.msk.mxu1 %vm161_vm3, %v160_v61  ;;  %v188_v0 = vsel %vm185_vm15, %v184_v62, %v145_v60  ;;  %1499 = vmatpush3.msra.mxu0 %v2156_v42  ;;  %2705 = vst [vmem:[#allocation6_spill] sm:$0xff] %v2183_v58  ;;  %v2190_v44 = vld [vmem:[%s2675_s3 + $0x38] sm:$0xff] }
  0xb9   :  { %1633 = vmatpush3.msk.msra.mxu1 %vm161_vm3, %v160_v61  ;;  %1500 = vmatprep.subr.mxu0 %v2162_v59  ;;  %2706 = vst [vmem:[#allocation7_spill] sm:$0xff] %v2190_v44 }
  0xba   :  { %1634 = vmatprep.subr.mxu1 %v188_v0  ;;  %1501 = vmatpush3.msra.mxu0 %v2175_v63 }
  0xbb   :  { %1635 = vmatpush3.msra.mxu1 %v188_v0  ;;  %1502 = vmatprep.subr.mxu0 %v2183_v58 }
  0xbc   :  { %1637 = vmatmul.mubr.msk.f32.vlgmr.msra.gmra.mxu1 %vm217_vm0, %v2068_v28  ;;  %1503 = vmatpush3.msra.mxu0 %v2190_v44 }
  0xbd   :  { %1639 = vmatprep.mubr.msk.f32.mxu1 %vm217_vm0, %v2106_v33  ;;  %1642 = vmatprep.subr.mxu1 %v2196_v1 }
  0xbe   :  { %1504 = vmatprep.subr.mxu0 %v2202_v2  ;;  %1643 = vmatpush3.msra.mxu1 %v2196_v1 }
  0xbf   :  { %1505 = vmatpush3.msra.mxu0 %v2210_v3  ;;  %1644 = vmatprep.subr.mxu1 %v2215_v4 }
  0xc0   :  { %1640 = vmatmul.mubr.msk.f32.gmra.mxu1 %vm217_vm0, %v2144_v39  ;;  %1506 = vmatprep.subr.mxu0 %v2223_v5 }
  0xc1   :  { %1645 = vmatpush3.msra.mxu1 %v2215_v4  ;;  %1507 = vmatpush3.msra.mxu0 %v2230_v6 }
  0xc2   :  { %1646 = vmatprep.subr.mxu1 %v2237_v7 }
  0xc3   :  { %v2245_v10 = vpop.permute.xlu0 %199  ;;  %v2247_v12 = vpop.permute.xlu1 %204  ;;  %1647 = vmatpush3.msra.mxu1 %v2237_v7 }
  0xc7   :  { %v2250_v13 = vpop.permute.xlu0 %214  ;;  %v2252_v15 = vpop.permute.xlu1 %209 }
  0xcb   :  { %v2254_v16 = vpop.permute.xlu0 %765  ;;  %v764_v18 = vpop.permute.xlu1 %763 }
  0xcc   :  { %v770_v20 = vsel %vm52_vm1, %v764_v18, %v2254_v16 }
  0xcd   :  { %v871_v27 = vsel %vm161_vm3, %v1893_v17, %v770_v20 }
  0xcf   :  { %v778_v21 = vpop.permute.xlu0 %777  ;;  %v762_v24 = vpop.permute.xlu1 %761 }
  0xd0   :  { %v769_v25 = vsel %vm52_vm1, %v762_v24, %v764_v18 }
  0xd1   :  { %v870_v31 = vsel %vm161_vm3, %v1899_v19, %v769_v25 }
  0xd3   :  { %v776_v32 = vpop.permute.xlu0 %775  ;;  %v2263_v30 = vpop.permute.xlu1 %779 }
  0xd4   :  { %v783_v35 = vsel %vm67_vm4, %v776_v32, %v778_v21  ;;  %v784_v38 = vsel %vm67_vm4, %v778_v21, %v2263_v30  ;;  %v2296_v32 = vld [vmem:[%s2675_s3 + $0xa0] sm:$0xff] }
  0xd5   :  { %v874_v40 = vsel %vm165_vm5, %v871_v27, %v784_v38  ;;  %v873_v43 = vsel %vm165_vm5, %v870_v31, %v783_v35  ;;  %2711 = vst [vmem:[#allocation12_spill] sm:$0xff] %v2296_v32  ;;  %1508 = vmatprep.subr.mxu0 %v2296_v32  ;;  %v2453_v32 = vld [vmem:[%s2675_s3 + $0x118] sm:$0xff] }
  0xd7   :  { %v2270_v45 = vpop.permute.xlu0 %793  ;;  %v792_v47 = vpop.permute.xlu1 %791 }
  0xd8   :  { %v798_v17 = vsel %vm82_vm6, %v792_v47, %v2270_v45 }
  0xd9   :  { %v877_v19 = vsel %vm169_vm7, %v874_v40, %v798_v17  ;;  %v2304_v40 = vld [vmem:[%s2675_s3 + $0x20] sm:$0xff]  ;;  %v2320_v17 = vld [vmem:[%s2675_s3 + $0x98] sm:$0xff] }
  0xda   :  { %2712 = vst [vmem:[#allocation13_spill] sm:$0xff] %v2304_v40  ;;  %1509 = vmatpush3.msra.mxu0 %v2304_v40  ;;  %2713 = vst [vmem:[#allocation14_spill] sm:$0xff] %v2320_v17 }
  0xdb   :  { %v806_v48 = vpop.permute.xlu0 %805  ;;  %v790_v50 = vpop.permute.xlu1 %789  ;;  %1510 = vmatprep.subr.mxu0 %v2320_v17 }
  0xdc   :  { %v797_v51 = vsel %vm82_vm6, %v790_v50, %v792_v47  ;;  %v2339_v50 = vld [vmem:[%s2675_s3 + $0x90] sm:$0xff] }
  0xdd   :  { %v876_v53 = vsel %vm169_vm7, %v873_v43, %v797_v51  ;;  %v2309_v43 = vld [vmem:[%s2675_s3 + $0x160] sm:$0xff]  ;;  %2715 = vst [vmem:[#allocation16_spill] sm:$0xff] %v2339_v50 }
  0xde   :  { %1648 = vmatprep.subr.mxu1 %v2309_v43 }
  0xdf   :  { %v804_v54 = vpop.permute.xlu0 %803  ;;  %v2277_v56 = vpop.permute.xlu1 %807  ;;  %1649 = vmatpush3.msra.mxu1 %v2309_v43 }
  0xe0   :  { %v811_v57 = vsel %vm97_vm8, %v804_v54, %v806_v48  ;;  %v812_v60 = vsel %vm97_vm8, %v806_v48, %v2277_v56  ;;  %v2332_v48 = vld [vmem:[%s2675_s3 + $0x158] sm:$0xff]  ;;  %v2348_v54 = vld [vmem:[%s2675_s3 + $0x10] sm:$0xff] }
  0xe1   :  { %v880_v61 = vsel %vm173_vm9, %v877_v19, %v812_v60  ;;  %v879_v62 = vsel %vm173_vm9, %v876_v53, %v811_v57  ;;  %v2327_v19 = vld [vmem:[%s2675_s3 + $0x18] sm:$0xff]  ;;  %1650 = vmatprep.subr.mxu1 %v2332_v48  ;;  %2716 = vst [vmem:[#allocation17_spill] sm:$0xff] %v2348_v54  ;;  %v2353_v57 = vld [vmem:[%s2675_s3 + $0x150] sm:$0xff] }
  0xe2   :  { %2714 = vst [vmem:[#allocation15_spill] sm:$0xff] %v2327_v19  ;;  %1511 = vmatpush3.msra.mxu0 %v2327_v19  ;;  %1651 = vmatpush3.msra.mxu1 %v2332_v48  ;;  %v2433_v19 = vld [vmem:[%s2675_s3 + $0x128] sm:$0xff] }
  0xe3   :  { %v2284_v0 = vpop.permute.xlu0 %821  ;;  %v820_v18 = vpop.permute.xlu1 %819  ;;  %1512 = vmatprep.subr.mxu0 %v2339_v50  ;;  %1652 = vmatprep.subr.mxu1 %v2353_v57 }
  0xe4   :  { %v826_v20 = vsel %vm112_vm10, %v820_v18, %v2284_v0  ;;  %1513 = vmatpush3.msra.mxu0 %v2348_v54  ;;  %1653 = vmatpush3.msra.mxu1 %v2353_v57  ;;  %v2420_v54 = vld [vmem:[%s2675_s3 + $0x130] sm:$0xff] }
  0xe5   :  { %v2289_v21 = vsel %vm177_vm11, %v880_v61, %v826_v20  ;;  %v2375_v20 = vld [vmem:[%s2675_s3 + $0x8] sm:$0xff] }
  0xe6   :  { %2718 = vst [vmem:[#allocation19_spill] sm:$0xff] %v2375_v20 }
  0xe7   :  { %v834_v24 = vpop.permute.xlu0 %833  ;;  %v818_v25 = vpop.permute.xlu1 %817 }
  0xe8   :  { %v825_v27 = vsel %vm112_vm10, %v818_v25, %v820_v18  ;;  %v2387_v25 = vld [vmem:[%s2675_s3 + $0x80] sm:$0xff] }
  0xe9   :  { %v882_v31 = vsel %vm177_vm11, %v879_v62, %v825_v27  ;;  %v2365_v62 = vld [vmem:[%s2675_s3 + $0x88] sm:$0xff]  ;;  %2719 = vst [vmem:[#allocation20_spill] sm:$0xff] %v2387_v25 }
  0xea   :  { %2717 = vst [vmem:[#allocation18_spill] sm:$0xff] %v2365_v62  ;;  %1514 = vmatprep.subr.mxu0 %v2365_v62 }
  0xeb   :  { %v862_v35 = vpop.permute.xlu0 %861  ;;  %v2298_v38 = vpop.permute.xlu1 %835  ;;  %1515 = vmatpush3.msra.mxu0 %v2375_v20 }
  0xec   :  { %v2313_v47 = vsel %vm127_vm12, %v834_v24, %v2298_v38  ;;  %1516 = vmatprep.subr.mxu0 %v2387_v25  ;;  %v2413_v25 = vld [vmem:[%s2675_s3 + $0x138] sm:$0xff] }
  0xef   :  { %v832_v51 = vpop.permute.xlu0 %831  ;;  %v2341_v53 = vpop.permute.xlu1 %863 }
  0xf0   :  { %v839_v60 = vsel %vm127_vm12, %v832_v51, %v834_v24  ;;  %v2358_v61 = vsel %vm157_vm2, %v862_v35, %v2341_v53  ;;  %v2380_v24 = vld [vmem:[%s2675_s3 + $0x148] sm:$0xff]  ;;  %v2396_v51 = vld [vmem:[%s2675_s3] sm:$0xff] }
  0xf1   :  { %v2368_v18 = vsel %vm181_vm14, %v882_v31, %v839_v60  ;;  %1654 = vmatprep.subr.mxu1 %v2380_v24  ;;  %2720 = vst [vmem:[#allocation21_spill] sm:$0xff] %v2396_v51  ;;  %v2401_v60 = vld [vmem:[%s2675_s3 + $0x140] sm:$0xff]  ;;  %1517 = vmatpush3.msra.mxu0 %v2396_v51 }
  0xf2   :  { %1655 = vmatpush3.msra.mxu1 %v2380_v24 }
  0xf3   :  { %v2389_v27 = vpop.permute.xlu0 %849  ;;  %v848_v31 = vpop.permute.xlu1 %847  ;;  %1656 = vmatprep.subr.mxu1 %v2401_v60 }
  0xf4   :  { %v2405_v9 = vsel %vm142_vm13, %v848_v31, %v2389_v27  ;;  %1657 = vmatpush3.msra.mxu1 %v2401_v60 }
  0xf5   :  { %1658 = vmatprep.subr.mxu1 %v2413_v25 }
  0xf6   :  { %1659 = vmatpush3.msra.mxu1 %v2413_v25 }
  0xf7   :  { %v846_v20 = vpop.permute.xlu0 %845  ;;  %v860_v62 = vpop.permute.xlu1 %859  ;;  %1660 = vmatprep.subr.mxu1 %v2420_v54 }
  0xf8   :  { %v2423_v51 = vsel %vm142_vm13, %v846_v20, %v848_v31  ;;  %v2426_v50 = vsel %vm157_vm2, %v860_v62, %v862_v35  ;;  %1661 = vmatpush3.msra.mxu1 %v2420_v54  ;;  %v2440_v35 = vld [vmem:[%s2675_s3 + $0x120] sm:$0xff] }
  0xf9   :  { %1662 = vmatprep.subr.mxu1 %v2433_v19 }
  0xfa   :  { %1663 = vmatpush3.msra.mxu1 %v2433_v19 }
  0xfb   :  { %v782_v17 = vpop.permute.xlu0 %781  ;;  %v768_v40 = vpop.permute.xlu1 %767  ;;  %1664 = vmatprep.subr.mxu1 %v2440_v35 }
  0xfc   :  { %v785_v62 = vsel %vm67_vm4, %v2263_v30, %v782_v17  ;;  %v771_v20 = vsel %vm52_vm1, %v2254_v16, %v768_v40  ;;  %1665 = vmatpush3.msra.mxu1 %v2440_v35  ;;  %v2461_v16 = vld [vmem:[%s2675_s3 + $0x110] sm:$0xff]  ;;  %vm656_vm1 = vcmask 261120   ;;  %vm1446_vm4 = vcmask 15368  }
  0xfd   :  { %v872_v31 = vsel %vm161_vm3, %v1884_v14, %v771_v20  ;;  %1666 = vmatprep.subr.mxu1 %v2453_v32  ;;  %v2473_v20 = vld [vmem:[%s2675_s3 + $0x108] sm:$0xff] }
  0xfe   :  { %v875_v6 = vsel %vm165_vm5, %v872_v31, %v785_v62  ;;  %1667 = vmatpush3.msra.mxu1 %v2453_v32 }
  0xff   :  { %v810_v30 = vpop.permute.xlu0 %809  ;;  %v796_v17 = vpop.permute.xlu1 %795  ;;  %1668 = vmatprep.subr.mxu1 %v2461_v16 }
 0x100   :  { %v813_v14 = vsel %vm97_vm8, %v2277_v56, %v810_v30  ;;  %v799_v40 = vsel %vm82_vm6, %v2270_v45, %v796_v17  ;;  %1669 = vmatpush3.msra.mxu1 %v2461_v16  ;;  %v2481_v45 = vld [vmem:[%s2675_s3 + $0x100] sm:$0xff] }
 0x101   :  { %v878_v62 = vsel %vm169_vm7, %v875_v6, %v799_v40  ;;  %1670 = vmatprep.subr.mxu1 %v2473_v20 }
 0x102   :  { %v881_v31 = vsel %vm173_vm9, %v878_v62, %v813_v14  ;;  %1671 = vmatpush3.msra.mxu1 %v2473_v20 }
 0x103   :  { %v838_v5 = vpop.permute.xlu0 %837  ;;  %v824_v56 = vpop.permute.xlu1 %823  ;;  %1672 = vmatprep.subr.mxu1 %v2481_v45 }
 0x104   :  { %v841_v6 = vsel %vm127_vm12, %v2298_v38, %v838_v5  ;;  %v827_v30 = vsel %vm112_vm10, %v2284_v0, %v824_v56  ;;  %1673 = vmatpush3.msra.mxu1 %v2481_v45 }
 0x105   :  { %v884_v17 = vsel %vm177_vm11, %v881_v31, %v827_v30 }
 0x106   :  { %v887_v14 = vsel %vm181_vm14, %v884_v17, %v841_v6 }
 0x107   :  { %v866_v40 = vpop.permute.xlu1 %865  ;;  %v852_v44 = vpop.permute.xlu0 %851 }
 0x108   :  { %v869_v62 = vsel %vm157_vm2, %v2341_v53, %v866_v40  ;;  %v855_v6 = vsel %vm142_vm13, %v2389_v27, %v852_v44  ;;  %vm738_vm2 = vcmask 7168  }
 0x109   :  { %1691 = vmatprep.subr.msk.mxu0 %vm161_vm3, %v869_v62 }
 0x16b   :  { %v302_v3 = vpop.f32.mrf.mxu0 }
 0x16c   :  { %v303_v5 = vadd.f32 %v302_v3, %v2245_v10 }
 0x16d   :  { %v304_v38 = vpop.f32.mrf.mxu0 }
 0x16e   :  { %v410_v2 = vmax.f32 %v303_v5, 0.0  ;;  %v305_v0 = vadd.f32 %v304_v38, %v2245_v10  ;;  %v890_v38 = vsel %vm185_vm15, %v887_v14, %v855_v6 }
 0x16f   :  { %v308_v56 = vpop.f32.mrf.mxu0 }
 0x170   :  { %v411_v31 = vmax.f32 %v305_v0, 0.0  ;;  %v309_v30 = vadd.f32 %v308_v56, %v2247_v12  ;;  %v422_v17 = vmin.f32 %v410_v2, 123.0 }
 0x171   :  { %v310_v58 = vpop.f32.mrf.mxu0 }
 0x172   :  { %v423_v53 = vmin.f32 %v411_v31, 123.0  ;;  %v413_v40 = vmax.f32 %v309_v30, 0.0  ;;  %v311_v63 = vadd.f32 %v310_v58, %v2247_v12 }
 0x173   :  { %v314_v59 = vpop.f32.mrf.mxu0 }
 0x174   :  { %v414_v3 = vmax.f32 %v311_v63, 0.0  ;;  %v315_v5 = vadd.f32 %v314_v59, %v2252_v15  ;;  %546 = vmatprep.mubr.f32.mxu0 %v423_v53  ;;  %v425_v42 = vmin.f32 %v413_v40, 123.0 }
 0x175   :  { %v316_v0 = vpop.f32.mrf.mxu0  ;;  %547 = vmatmul.mubr.f32.vlgmr.msra.gmra.mxu0 %v422_v17 }
 0x176   :  { %v426_v56 = vmin.f32 %v414_v3, 123.0  ;;  %v416_v55 = vmax.f32 %v315_v5, 0.0  ;;  %v317_v44 = vadd.f32 %v316_v0, %v2252_v15  ;;  %1692 = vmatpush3.msk.msra.mxu0 %vm161_vm3, %v869_v62 }
 0x177   :  { %v320_v2 = vpop.f32.mrf.mxu0  ;;  %1693 = vmatprep.subr.mxu0 %v890_v38 }
 0x178   :  { %v417_v27 = vmax.f32 %v317_v44, 0.0  ;;  %v321_v58 = vadd.f32 %v320_v2, %v2250_v13  ;;  %551 = vmatprep.mubr.f32.mxu0 %v426_v56  ;;  %1694 = vmatpush3.msra.mxu0 %v890_v38  ;;  %v428_v59 = vmin.f32 %v416_v55, 123.0 }
 0x179   :  { %v322_v63 = vpop.f32.mrf.mxu0  ;;  %552 = vmatmul.mubr.f32.gmra.mxu0 %v425_v42  ;;  %1701 = vmatprep.subr.mxu0 %v2196_v1 }
 0x17a   :  { %v429_v14 = vmin.f32 %v417_v27, 123.0  ;;  %v323_v31 = vadd.f32 %v322_v63, %v2250_v13  ;;  %v419_v30 = vmax.f32 %v321_v58, 0.0 }
 0x17c   :  { %v420_v6 = vmax.f32 %v323_v31, 0.0  ;;  %v1638_v17 = vpop.f32.mrf.mxu1  ;;  %556 = vmatprep.mubr.f32.mxu0 %v429_v14  ;;  %v431_v3 = vmin.f32 %v419_v30, 123.0 }
 0x17d   :  { %v397_v62 = vadd.f32 %v1638_v17, %v2247_v12  ;;  %557 = vmatmul.mubr.f32.gmra.mxu0 %v428_v59 }
 0x17e   :  { %v432_v53 = vmin.f32 %v420_v6, 123.0  ;;  %v391_v40 = vpop.f32.mrf.mxu1 }
 0x17f   :  { %v392_v5 = vadd.f32 %v391_v40, %v2245_v10  ;;  %v415_v55 = vmax.f32 %v397_v62, 0.0 }
 0x180   :  { %v1641_v38 = vpop.f32.mrf.mxu1  ;;  %561 = vmatprep.mubr.f32.mxu0 %v432_v53 }
 0x181   :  { %v412_v42 = vmax.f32 %v392_v5, 0.0  ;;  %v407_v0 = vadd.f32 %v1641_v38, %v2250_v13  ;;  %562 = vmatmul.mubr.f32.gmra.mxu0 %v431_v3  ;;  %v427_v2 = vmin.f32 %v415_v55, 123.0 }
 0x182   :  { %v401_v56 = vpop.f32.mrf.mxu1  ;;  %1695 = vmatprep.mubr.msk.f32.mxu0 %vm217_vm0, %v1869_v11  ;;  %v886_v11 = vsel %vm181_vm14, %v2289_v21, %v2313_v47 }
 0x183   :  { %v424_v44 = vmin.f32 %v412_v42, 123.0  ;;  %v402_v12 = vadd.f32 %v401_v56, %v2252_v15  ;;  %v421_v27 = vmax.f32 %v407_v0, 0.0 }
 0x185   :  { %v418_v58 = vmax.f32 %v402_v12, 0.0  ;;  %1674 = vmatprep.mubr.f32.mxu1 %v424_v44  ;;  %1696 = vmatmul.mubr.msk.f32.vlgmr.msra.gmra.mxu0 %vm217_vm0, %v2068_v28  ;;  %v433_v13 = vmin.f32 %v421_v27, 123.0 }
 0x186   :  { %1675 = vmatmul.mubr.f32.vlgmr.msra.gmra.mxu1 %v427_v2  ;;  %1698 = vmatprep.mubr.msk.f32.mxu0 %vm217_vm0, %v2106_v33 }
 0x187   :  { %v430_v10 = vmin.f32 %v418_v58, 123.0  ;;  %1702 = vmatpush3.msra.mxu0 %v2196_v1  ;;  %v2555_v1 = vsel %vm185_vm15, %v886_v11, %v2405_v9  ;;  %v653_v58 = vld [vmem:[%s2676_s4 + $0x8] sm:$0x3] }
 0x188   :  { %1703 = vmatprep.subr.mxu0 %v2215_v4  ;;  %v2739_v11 = vld [vmem:[#allocation19_spill] sm:$0xff] }
 0x189   :  { %1677 = vmatprep.mubr.f32.mxu1 %v430_v10  ;;  %1699 = vmatmul.mubr.msk.f32.gmra.mxu0 %vm217_vm0, %v2144_v39  ;;  %v2721_v10 = vmov 0.0  }
 0x18a   :  { %1678 = vmatmul.mubr.f32.gmra.mxu1 %v433_v13  ;;  %1704 = vmatpush3.msra.mxu0 %v2215_v4  ;;  %v2560_v4 = vsel %vm185_vm15, %v2368_v18, %v2423_v51  ;;  %v1763_v13 = vld [vmem:[%s2673_s1] sm:$0xff] }
 0x18b   :  { %1705 = vmatprep.subr.mxu0 %v2237_v7 }
 0x18c   :  { %1706 = vmatpush3.msra.mxu0 %v2237_v7  ;;  %v652_v7 = vld [vmem:[%s2676_s4] sm:$0xff] }
 0x18d   :  { %1707 = vmatprep.subr.mxu0 %v2309_v43  ;;  %1688 = vmatprep.mubr.msk.f32.mxu1 %vm656_vm1, %v652_v7 }
 0x18e   :  { %1708 = vmatpush3.msra.mxu0 %v2309_v43 }
 0x18f   :  { %1709 = vmatprep.subr.mxu0 %v2332_v48 }
 0x190   :  { %1710 = vmatpush3.msra.mxu0 %v2332_v48  ;;  %v2566_v48 = vpop.permute.xlu0 %906 }
 0x191   :  { %1711 = vmatprep.subr.mxu0 %v2353_v57 }
 0x192   :  { %1712 = vmatpush3.msra.mxu0 %v2353_v57  ;;  %v2568_v57 = vpop.permute.xlu1 %901 }
 0x193   :  { %1713 = vmatprep.subr.mxu0 %v2380_v24 }
 0x194   :  { %1714 = vmatpush3.msra.mxu0 %v2380_v24 }
 0x195   :  { %1715 = vmatprep.subr.mxu0 %v2401_v60 }
 0x196   :  { %1716 = vmatpush3.msra.mxu0 %v2401_v60  ;;  %v2575_v30 = vpop.permute.xlu1 %911 }
 0x197   :  { %1717 = vmatprep.subr.mxu0 %v2413_v25 }
 0x198   :  { %1718 = vmatpush3.msra.mxu0 %v2413_v25 }
 0x199   :  { %1719 = vmatprep.subr.mxu0 %v2420_v54 }
 0x19a   :  { %1720 = vmatpush3.msra.mxu0 %v2420_v54 }
 0x19b   :  { %1721 = vmatprep.subr.mxu0 %v2433_v19 }
 0x19c   :  { %1722 = vmatpush3.msra.mxu0 %v2433_v19 }
 0x19d   :  { %1723 = vmatprep.subr.mxu0 %v2440_v35 }
 0x19e   :  { %1724 = vmatpush3.msra.mxu0 %v2440_v35 }
 0x19f   :  { %1725 = vmatprep.subr.mxu0 %v2453_v32 }
 0x1a0   :  { %1726 = vmatpush3.msra.mxu0 %v2453_v32 }
 0x1a1   :  { %1727 = vmatprep.subr.mxu0 %v2461_v16 }
 0x1a2   :  { %1728 = vmatpush3.msra.mxu0 %v2461_v16  ;;  %v2572_v16 = vpop.permute.xlu0 %916 }
 0x1a3   :  { %1729 = vmatprep.subr.mxu0 %v2473_v20 }
 0x1a4   :  { %1730 = vmatpush3.msra.mxu0 %v2473_v20 }
 0x1a5   :  { %1731 = vmatprep.subr.mxu0 %v2481_v45 }
 0x1a6   :  { %1732 = vmatpush3.msra.mxu0 %v2481_v45 }
 0x235   :  { %v1518_v15 = vpop.f32.mrf.mxu0 }
 0x237   :  { %v1519_v32 = vpop.f32.mrf.mxu0 }
 0x238   :  { %v1520_v56 = vadd.f32 %v1519_v32, %v1518_v15  ;;  %v2641_v32 = vld [vmem:[%s2677_s5] sm:$0xff] }
 0x239   :  { %v1521_v43 = vpop.f32.mrf.mxu0 }
 0x23b   :  { %v1522_v21 = vpop.f32.mrf.mxu0 }
 0x23c   :  { %v1523_v5 = vadd.f32 %v1522_v21, %v1521_v43 }
 0x23d   :  { %v1524_v47 = vpop.f32.mrf.mxu0 }
 0x23f   :  { %v1525_v19 = vpop.f32.mrf.mxu0 }
 0x240   :  { %v1526_v6 = vadd.f32 %v1525_v19, %v1524_v47 }
 0x241   :  { %v1527_v9 = vpop.f32.mrf.mxu0 }
 0x243   :  { %v1528_v54 = vpop.f32.mrf.mxu0 }
 0x244   :  { %v1529_v20 = vadd.f32 %v1528_v54, %v1527_v9 }
 0x245   :  { %v1697_v18 = vpop.f32.mrf.mxu0 }
 0x246   :  { %v1098_v24 = vadd.f32 %v1697_v18, %v2566_v48  ;;  %v1676_v25 = vpop.f32.mrf.mxu1 }
 0x247   :  { %v1092_v51 = vpop.f32.mrf.mxu0  ;;  %v639_v44 = vadd.f32 %v1676_v25, %v1523_v5 }
 0x248   :  { %v1093_v60 = vadd.f32 %v1092_v51, %v2568_v57  ;;  %v633_v35 = vpop.f32.mrf.mxu1  ;;  %v1116_v45 = vmax.f32 %v1098_v24, 0.0 }
 0x249   :  { %v1700_v59 = vpop.f32.mrf.mxu0  ;;  %v634_v2 = vadd.f32 %v1520_v56, %v633_v35 }
 0x24a   :  { %v1113_v63 = vmax.f32 %v1093_v60, 0.0  ;;  %v1108_v14 = vadd.f32 %v1700_v59, %v2572_v16  ;;  %v1679_v31 = vpop.f32.mrf.mxu1  ;;  %v1128_v55 = vmin.f32 %v1116_v45, 123.0 }
 0x24b   :  { %v649_v17 = vadd.f32 %v1679_v31, %v1529_v20  ;;  %v1102_v62 = vpop.f32.mrf.mxu0 }
 0x24c   :  { %v1125_v53 = vmin.f32 %v1113_v63, 123.0  ;;  %v1103_v40 = vadd.f32 %v1102_v62, %v2575_v30  ;;  %v643_v3 = vpop.f32.mrf.mxu1  ;;  %v1122_v38 = vmax.f32 %v1108_v14, 0.0 }
 0x24d   :  { %v644_v42 = vadd.f32 %v1526_v6, %v643_v3  ;;  %1680 = vmatprep.subr.mxu1 %v649_v17 }
 0x24e   :  { %v1119_v0 = vmax.f32 %v1103_v40, 0.0  ;;  %1681 = vmatpush3.msra.mxu1 %v649_v17  ;;  %1733 = vmatprep.mubr.f32.mxu0 %v1125_v53  ;;  %v1134_v27 = vmin.f32 %v1122_v38, 123.0 }
 0x24f   :  { %1682 = vmatprep.subr.mxu1 %v644_v42  ;;  %1734 = vmatmul.mubr.f32.vlgmr.msra.gmra.mxu0 %v1128_v55 }
 0x250   :  { %v1131_v12 = vmin.f32 %v1119_v0, 123.0  ;;  %1683 = vmatpush3.msra.mxu1 %v644_v42 }
 0x251   :  { %1684 = vmatprep.subr.mxu1 %v639_v44 }
 0x252   :  { %1685 = vmatpush3.msra.mxu1 %v639_v44  ;;  %1736 = vmatprep.mubr.f32.mxu0 %v1131_v12 }
 0x253   :  { %1686 = vmatprep.subr.mxu1 %v634_v2  ;;  %1737 = vmatmul.mubr.f32.gmra.mxu0 %v1134_v27 }
 0x254   :  { %1687 = vmatpush3.msra.mxu1 %v634_v2  ;;  %1747 = vmatprep.mubr.msk.f32.mxu0 %vm656_vm1, %v652_v7  ;;  %v655_v7 = vld [vmem:[%s2677_s5 + $0x8] sm:$0x3] }
 0x255   :  { %1689 = vmatmul.mubr.msk.f32.vlgmr.msra.gmra.mxu1 %vm656_vm1, %v653_v58  ;;  %1467 = vmatprep.subr.msk.mxu1 %vm161_vm3, %v2358_v61  ;;  %v2738_v61 = vld [vmem:[#allocation18_spill] sm:$0xff] }
 0x256   :  { %1468 = vmatpush1.msk.msra.mxu1 %vm161_vm3, %v2426_v50  ;;  %1001 = vmatprep.mubr.f32.mxu1 %v2721_v10  ;;  %v2737_v50 = vld [vmem:[#allocation17_spill] sm:$0xff]  ;;  %vm1448_vm3 = vcmask 9224  }
 0x257   :  { %967 = vmatprep.subr.mxu1 %v2555_v1  ;;  %v2740_v1 = vld [vmem:[#allocation20_spill] sm:$0xff] }
 0x258   :  { %968 = vmatpush1.msra.mxu1 %v2560_v4  ;;  %v2741_v4 = vld [vmem:[#allocation21_spill] sm:$0xff] }
 0x259   :  { %1469 = vmatmul.mubr.msk.f32.vlgmr.msra.gmra.mxu1 %vm217_vm0, %v1763_v13  ;;  %1562 = vmatprep.subr.mxu1 %v2038_v22  ;;  %v2722_v22 = vld [vmem:[#allocation2_spill] sm:$0xff] }
 0x25a   :  { %1007 = vmatprep.mubr.f32.mxu1 %v2721_v10  ;;  %1563 = vmatpush3.msra.mxu1 %v2043_v23  ;;  %v2723_v23 = vld [vmem:[#allocation3_spill] sm:$0xff] }
 0x25b   :  { %1564 = vmatprep.subr.mxu1 %v2048_v26  ;;  %v2724_v26 = vld [vmem:[#allocation4_spill] sm:$0xff] }
 0x25c   :  { %1565 = vmatpush3.msra.mxu1 %v2058_v29  ;;  %v2725_v29 = vld [vmem:[#allocation5_spill] sm:$0xff] }
 0x25d   :  { %1470 = vmatmul.mubr.msk.f32.gmra.mxu1 %vm217_vm0, %v2068_v28  ;;  %1566 = vmatprep.subr.mxu1 %v2074_v34  ;;  %v2726_v28 = vld [vmem:[#allocation6_spill] sm:$0xff]  ;;  %v2727_v34 = vld [vmem:[#allocation7_spill] sm:$0xff] }
 0x25e   :  { %1013 = vmatprep.mubr.f32.mxu1 %v2721_v10  ;;  %1567 = vmatpush3.msra.mxu1 %v2080_v8  ;;  %v2728_v8 = vld [vmem:[#allocation8_spill] sm:$0xff] }
 0x25f   :  { %1568 = vmatprep.subr.mxu1 %v2086_v37  ;;  %v2729_v37 = vld [vmem:[#allocation9_spill] sm:$0xff] }
 0x260   :  { %1569 = vmatpush3.msra.mxu1 %v2097_v41  ;;  %v2730_v41 = vld [vmem:[#allocation10_spill] sm:$0xff] }
 0x261   :  { %1471 = vmatmul.mubr.msk.f32.gmra.mxu1 %vm217_vm0, %v2106_v33  ;;  %1570 = vmatprep.subr.mxu1 %v2112_v46  ;;  %v2731_v33 = vld [vmem:[#allocation11_spill] sm:$0xff]  ;;  %v2732_v46 = vld [vmem:[#allocation12_spill] sm:$0xff] }
 0x262   :  { %1019 = vmatprep.mubr.f32.mxu1 %v2721_v10  ;;  %1571 = vmatpush3.msra.mxu1 %v2118_v36  ;;  %v2733_v36 = vld [vmem:[#allocation13_spill] sm:$0xff] }
 0x263   :  { %1572 = vmatprep.subr.mxu1 %v2124_v49  ;;  %v2734_v49 = vld [vmem:[#allocation14_spill] sm:$0xff] }
 0x264   :  { %1573 = vmatpush3.msra.mxu1 %v2135_v52  ;;  %v2735_v52 = vld [vmem:[#allocation15_spill] sm:$0xff] }
 0x265   :  { %1472 = vmatmul.mubr.msk.f32.gmra.mxu1 %vm217_vm0, %v2144_v39  ;;  %1574 = vmatprep.subr.mxu1 %v2722_v22  ;;  %v2736_v39 = vld [vmem:[#allocation16_spill] sm:$0xff]  ;;  %vm740_vm0 = vcmask 1024  }
 0x266   :  { %1575 = vmatpush3.msra.mxu1 %v2723_v23 }
 0x267   :  { %1576 = vmatprep.subr.mxu1 %v2724_v26 }
 0x268   :  { %1577 = vmatpush3.msra.mxu1 %v2725_v29 }
 0x269   :  { %1578 = vmatprep.subr.mxu1 %v2726_v28 }
 0x26a   :  { %1579 = vmatpush3.msra.mxu1 %v2727_v34 }
 0x26b   :  { %1580 = vmatprep.subr.mxu1 %v2728_v8 }
 0x26c   :  { %1581 = vmatpush3.msra.mxu1 %v2729_v37 }
 0x26d   :  { %1582 = vmatprep.subr.mxu1 %v2730_v41 }
 0x26e   :  { %1583 = vmatpush3.msra.mxu1 %v2731_v33 }
 0x26f   :  { %1584 = vmatprep.subr.mxu1 %v2732_v46 }
 0x270   :  { %1585 = vmatpush3.msra.mxu1 %v2733_v36 }
 0x271   :  { %1586 = vmatprep.subr.mxu1 %v2734_v49 }
 0x272   :  { %1587 = vmatpush3.msra.mxu1 %v2735_v52 }
 0x273   :  { %1588 = vmatprep.subr.mxu1 %v2736_v39  ;;  %v1354_v39 = vld [vmem:[%s2676_s4 + $0x8] sm:$0x3] }
 0x274   :  { %1589 = vmatpush3.msra.mxu1 %v2737_v50  ;;  %v1356_v50 = vld [vmem:[%s2677_s5 + $0x8] sm:$0x3] }
 0x275   :  { %1590 = vmatprep.subr.mxu1 %v2738_v61 }
 0x276   :  { %1591 = vmatpush3.msra.mxu1 %v2739_v11 }
 0x277   :  { %1592 = vmatprep.subr.mxu1 %v2740_v1 }
 0x278   :  { %1593 = vmatpush3.msra.mxu1 %v2741_v4 }
 0x30f   :  { %v1735_v10 = vpop.f32.mrf.mxu0 }
 0x311   :  { %v1334_v23 = vpop.f32.mrf.mxu0 }
 0x313   :  { %v1738_v28 = vpop.f32.mrf.mxu0 }
 0x315   :  { %v1690_v15 = vpop.f32.mrf.mxu1  ;;  %v1344_v33 = vpop.f32.mrf.mxu0 }
 0x316   :  { %v735_v43 = vadd.f32 %v1690_v15, %v655_v7 }
 0x317   :  { %v729_v21 = vpop.f32.mrf.mxu1 }
 0x318   :  { %741 = vst.msk [vmem:[%s2678_s6 + $0x8] sm:$0x3] %vm740_vm0, %v735_v43  ;;  %v730_v47 = vadd.f32 %v729_v21, %v2641_v32 }
 0x319   :  { %v1003_v19 = vpop.f32.mrf.mxu1 }
 0x31a   :  { %739 = vst.msk [vmem:[%s2678_s6] sm:$0xff] %vm738_vm2, %v730_v47  ;;  %v1004_v9 = vadd.f32 %v1003_v19, %v2568_v57 }
 0x31b   :  { %v1005_v54 = vpop.f32.mrf.mxu1 }
 0x31c   :  { %v1006_v18 = vadd.f32 %v1005_v54, %v2568_v57  ;;  %v1111_v24 = vmax.f32 %v1004_v9, 0.0 }
 0x31d   :  { %v1009_v25 = vpop.f32.mrf.mxu1 }
 0x31e   :  { %v1112_v51 = vmax.f32 %v1006_v18, 0.0  ;;  %v1010_v60 = vadd.f32 %v1009_v25, %v2566_v48  ;;  %v1123_v59 = vmin.f32 %v1111_v24, 123.0 }
 0x31f   :  { %v1011_v35 = vpop.f32.mrf.mxu1 }
 0x320   :  { %v1124_v20 = vmin.f32 %v1112_v51, 123.0  ;;  %v1012_v45 = vadd.f32 %v1011_v35, %v2566_v48  ;;  %v1114_v63 = vmax.f32 %v1010_v60, 0.0 }
 0x321   :  { %v1015_v14 = vpop.f32.mrf.mxu1 }
 0x322   :  { %v1115_v31 = vmax.f32 %v1012_v45, 0.0  ;;  %v1016_v6 = vadd.f32 %v1015_v14, %v2575_v30  ;;  %1247 = vmatprep.mubr.f32.mxu1 %v1124_v20  ;;  %v1126_v53 = vmin.f32 %v1114_v63, 123.0 }
 0x323   :  { %v1017_v17 = vpop.f32.mrf.mxu1  ;;  %1248 = vmatmul.mubr.f32.vlgmr.msra.gmra.mxu1 %v1123_v59 }
 0x324   :  { %v1127_v62 = vmin.f32 %v1115_v31, 123.0  ;;  %v1018_v57 = vadd.f32 %v1017_v17, %v2575_v30  ;;  %v1117_v40 = vmax.f32 %v1016_v6, 0.0 }
 0x325   :  { %v1021_v3 = vpop.f32.mrf.mxu1 }
 0x326   :  { %v1118_v5 = vmax.f32 %v1018_v57, 0.0  ;;  %v1022_v55 = vadd.f32 %v1021_v3, %v2572_v16  ;;  %1252 = vmatprep.mubr.f32.mxu1 %v1127_v62  ;;  %v1129_v0 = vmin.f32 %v1117_v40, 123.0 }
 0x327   :  { %v1023_v48 = vpop.f32.mrf.mxu1  ;;  %1253 = vmatmul.mubr.f32.gmra.mxu1 %v1126_v53 }
 0x328   :  { %v1130_v38 = vmin.f32 %v1118_v5, 123.0  ;;  %v1024_v42 = vadd.f32 %v1023_v48, %v2572_v16  ;;  %v1120_v56 = vmax.f32 %v1022_v55, 0.0 }
 0x32a   :  { %v1121_v44 = vmax.f32 %v1024_v42, 0.0  ;;  %1257 = vmatprep.mubr.f32.mxu1 %v1130_v38  ;;  %v1132_v2 = vmin.f32 %v1120_v56, 123.0 }
 0x32b   :  { %1258 = vmatmul.mubr.f32.gmra.mxu1 %v1129_v0 }
 0x32c   :  { %v1133_v12 = vmin.f32 %v1121_v44, 123.0 }
 0x32e   :  { %1262 = vmatprep.mubr.f32.mxu1 %v1133_v12 }
 0x32f   :  { %1263 = vmatmul.mubr.f32.gmra.mxu1 %v1132_v2 }
 0x3e3   :  { %v1594_v30 = vpop.f32.mrf.mxu1 }
 0x3e5   :  { %v1595_v27 = vpop.f32.mrf.mxu1 }
 0x3e6   :  { %v1596_v46 = vadd.f32 %v1595_v27, %v1594_v30 }
 0x3e7   :  { %v1597_v58 = vpop.f32.mrf.mxu1 }
 0x3e8   :  { %v1335_v52 = vadd.f32 %v1596_v46, %v1334_v23 }
 0x3e9   :  { %v1598_v13 = vpop.f32.mrf.mxu1 }
 0x3ea   :  { %v1599_v37 = vadd.f32 %v1598_v13, %v1597_v58 }
 0x3eb   :  { %v1600_v22 = vpop.f32.mrf.mxu1 }
 0x3ec   :  { %v1340_v49 = vadd.f32 %v1735_v10, %v1599_v37 }
 0x3ed   :  { %v1601_v26 = vpop.f32.mrf.mxu1 }
 0x3ee   :  { %v1602_v34 = vadd.f32 %v1601_v26, %v1600_v22 }
 0x3ef   :  { %v1603_v29 = vpop.f32.mrf.mxu1 }
 0x3f0   :  { %v1345_v36 = vadd.f32 %v1602_v34, %v1344_v33 }
 0x3f1   :  { %v1604_v16 = vpop.f32.mrf.mxu1 }
 0x3f2   :  { %v1605_v8 = vadd.f32 %v1604_v16, %v1603_v29 }
 0x3f4   :  { %v1350_v41 = vadd.f32 %v1738_v28, %v1605_v8 }
 0x3f6   :  { %1739 = vmatprep.subr.mxu0 %v1350_v41 }
 0x3f7   :  { %1740 = vmatpush3.msra.mxu0 %v1350_v41 }
 0x3f8   :  { %1741 = vmatprep.subr.mxu0 %v1345_v36 }
 0x3f9   :  { %1742 = vmatpush3.msra.mxu0 %v1345_v36 }
 0x3fa   :  { %1743 = vmatprep.subr.mxu0 %v1340_v49 }
 0x3fb   :  { %1744 = vmatpush3.msra.mxu0 %v1340_v49 }
 0x3fc   :  { %1745 = vmatprep.subr.mxu0 %v1335_v52 }
 0x3fd   :  { %1746 = vmatpush3.msra.mxu0 %v1335_v52 }
 0x3fe   :  { %1748 = vmatmul.mubr.msk.f32.vlgmr.msra.gmra.mxu0 %vm656_vm1, %v1354_v39 }
 0x4be   :  { %v1749_v61 = vpop.f32.mrf.mxu0 }
 0x4bf   :  { %v1435_v11 = vadd.f32 %v1749_v61, %v1356_v50 }
 0x4c0   :  { %v1429_v1 = vpop.f32.mrf.mxu0 }
 0x4c1   :  { %v1430_v4 = vadd.f32 %v1429_v1, %v2641_v32  ;;  %1442 = vrot.lane.b32.xlu0 %v1435_v11, %s1774_s28 }
 0x4c3   :  { %1440 = vrot.lane.b32.xlu1 %v1430_v4, %s1774_s28 }
 0x533   :  { %v1443_v7 = vpop.permute.xlu0 %1442 }
 0x534   :  { %1449 = vst.msk [vmem:[%s2678_s6 + $0x8] sm:$0x3] %vm1448_vm3, %v1443_v7 }
 0x535   :  { %v1441_v15 = vpop.permute.xlu1 %1440 }
 0x536   :  { %1447 = vst.msk [vmem:[%s2678_s6] sm:$0xff] %vm1446_vm4, %v1441_v15 }

</bundles_post_ra>
